<compile_context>
chip_gen: v7x
topology: tpu7x:2x2x1
jax: 0.10.0
libtpu: 0.0.40
codegen_flags: <defaults>
</compile_context>

<pallas_src>
import numpy as np
import jax
import jax.numpy as jnp
from jax import lax
from jax.experimental import pallas as pl
from jax.experimental.pallas import tpu as pltpu

LN_EPS = 1e-5  # PyTorch nn.LayerNorm default
WEIGHTS_FINAL_INIT = 0.003
BIAS_FINAL_INIT = 0.0003


# ----------------------------- Pallas kernel --------------------------------
def actor_kernel(
    x_ref,
    w1_ref, r1_ref,
    w2_ref, r2_ref,
    w3_ref, r3_ref,
    wm_ref, bm_ref,
    o_ref,
):
    # r*_ref layout: row 0 = bias, row 1 = LayerNorm gamma, row 2 = LayerNorm beta.

    def linear_bf16(h_bf16, w_ref, b_row):
        # bf16 MXU operands, f32 accumulation; bias added in f32.
        acc = jnp.dot(h_bf16, w_ref[...], preferred_element_type=jnp.float32)
        return acc + b_row

    def layernorm_relu(h, g_row, b_row):
        # One-pass stats: sum(h) and sum(h*h) are independent, so the two
        # XLU cross-lane reductions can overlap (2 XLUs on v6e/v7x).
        inv_f = 1.0 / h.shape[-1]
        mean = jnp.sum(h, axis=-1, keepdims=True) * inv_f
        ex2 = jnp.sum(h * h, axis=-1, keepdims=True) * inv_f
        var = jnp.maximum(ex2 - mean * mean, 0.0)          # clamp vs. cancellation
        hn = (h - mean) * lax.rsqrt(var + LN_EPS)           # rsqrt -> EUP slot
        return jnp.maximum(hn * g_row + b_row, 0.0)

    # Layer 1: input already bf16 (cast once in the wrapper).
    h = layernorm_relu(linear_bf16(x_ref[...], w1_ref, r1_ref[0:1, :]),
                       r1_ref[1:2, :], r1_ref[2:3, :])
    h = layernorm_relu(linear_bf16(h.astype(jnp.bfloat16), w2_ref, r2_ref[0:1, :]),
                       r2_ref[1:2, :], r2_ref[2:3, :])
    h = layernorm_relu(linear_bf16(h.astype(jnp.bfloat16), w3_ref, r3_ref[0:1, :]),
                       r3_ref[1:2, :], r3_ref[2:3, :])

    # Final layer: lane-padded weights (MXU-friendly), narrow store.
    acc = linear_bf16(h.astype(jnp.bfloat16), wm_ref, bm_ref[...])   # [tb, out_pad]
    n_out = o_ref.shape[-1]
    o_ref[...] = jnp.tanh(acc[:, :n_out]).astype(o_ref.dtype)


# ------------------------------- wrapper -------------------------------------
def _round_up(n, m):
    return ((n + m - 1) // m) * m


def actor_forward(x, params, block_b=1024):
    """x: [B, num_inputs] float32.  params: dict of kernel-layout arrays."""
    B, num_inputs = x.shape
    h0 = params["w1"].shape[1]
    h1 = params["w2"].shape[1]
    h2, num_outputs = params["wm"].shape

    # Final-layer weights lane-padded to 128 (VMEM / MXU only; the HBM output
    # stays num_outputs wide).
    out_pad = _round_up(max(num_outputs, 128), 128)
    wm_p = jnp.zeros((h2, out_pad), jnp.float32).at[:, :num_outputs].set(params["wm"])
    bm_p = jnp.zeros((1, out_pad), jnp.float32).at[:, :num_outputs].set(params["bm"])

    # bf16 MXU operands (cast once here, not per grid step).
    w1 = params["w1"].astype(jnp.bfloat16)
    w2 = params["w2"].astype(jnp.bfloat16)
    w3 = params["w3"].astype(jnp.bfloat16)
    wm = wm_p.astype(jnp.bfloat16)

    # Pack per-layer row params [bias; gamma; beta] into one [3, F] buffer each.
    r1 = jnp.concatenate([params["b1"], params["g1"], params["be1"]], axis=0)
    r2 = jnp.concatenate([params["b2"], params["g2"], params["be2"]], axis=0)
    r3 = jnp.concatenate([params["b3"], params["g3"], params["be3"]], axis=0)

    # Batch tiling:
    #  * nsteps derived from B and block_b, forced even (and >= 2) when B > 8
    #    so v7x's two TensorCores both get work under "parallel" semantics.
    #  * tb sized from B (multiple of 8) so ragged batches pad by < 8*nsteps rows.
    nsteps = pl.cdiv(B, block_b)
    if B > 8:
        nsteps = max(2, nsteps + (nsteps % 2))
    tb = _round_up(pl.cdiv(B, nsteps), 8)
    b_pad = tb * nsteps

    xb = x.astype(jnp.bfloat16)                 # halve input HBM traffic
    if b_pad != B:
        xb = jnp.pad(xb, ((0, b_pad - B), (0, 0)))
    grid = (nsteps,)

    def resident(arr):
        # Full-array block, same block every grid step -> stays VMEM-resident.
        return pl.BlockSpec(arr.shape, lambda i: (0,) * arr.ndim)

    flops = 2 * b_pad * (num_inputs * h0 + h0 * h1 + h1 * h2 + h2 * out_pad)
    transcendentals = b_pad * (3 + num_outputs)  # 3x rsqrt + tanh per row
    bytes_accessed = (
        b_pad * num_inputs * 2                  # bf16 input
        + b_pad * num_outputs * 4               # narrow f32 output
        + sum(int(a.size) * a.dtype.itemsize
              for a in (w1, r1, w2, r2, w3, r3, wm, bm_p))
    )

    out = pl.pallas_call(
        actor_kernel,
        out_shape=jax.ShapeDtypeStruct((b_pad, num_outputs), jnp.float32),
        grid=grid,
        in_specs=[
            pl.BlockSpec((tb, num_inputs), lambda i: (i, 0)),
            resident(w1), resident(r1),
            resident(w2), resident(r2),
            resident(w3), resident(r3),
            resident(wm), resident(bm_p),
        ],
        out_specs=pl.BlockSpec((tb, num_outputs), lambda i: (i, 0)),
        compiler_params=pltpu.CompilerParams(
            dimension_semantics=("parallel",),
            vmem_limit_bytes=32 * 1024 * 1024,  # safe on v7x's 64 MiB VMEM
        ),
        cost_estimate=pl.CostEstimate(
            flops=flops,
            transcendentals=transcendentals,
            bytes_accessed=bytes_accessed,
        ),
    )(xb, w1, r1, w2, r2, w3, r3, wm, bm_p)

    return out[:B] if b_pad != B else out


# ------------------------- deterministic parameter init ---------------------
def fan_in_uniform(key, shape, fan_in):
    w = 1.0 / np.sqrt(fan_in)
    return jax.random.uniform(key, shape, dtype=jnp.float32, minval=-w, maxval=w)


def init_actor_params(key, num_inputs, hidden_size, num_outputs):
    """Mirrors Actor.__init__ init scheme. Weights are stored as [in, out]."""
    keys = jax.random.split(key, 8)
    h0, h1, h2 = hidden_size

    # fan_in_uniform_init uses tensor.size(-1):
    #  - PyTorch weight is [out, in]  -> fan_in = in_features
    #  - PyTorch bias   is [out]      -> fan_in = out_features
    params = {
        "w1": fan_in_uniform(keys[0], (num_inputs, h0), num_inputs),
        "b1": fan_in_uniform(keys[1], (1, h0), h0),
        "g1": jnp.ones((1, h0), jnp.float32),
        "be1": jnp.zeros((1, h0), jnp.float32),

        "w2": fan_in_uniform(keys[2], (h0, h1), h0),
        "b2": fan_in_uniform(keys[3], (1, h1), h1),
        "g2": jnp.ones((1, h1), jnp.float32),
        "be2": jnp.zeros((1, h1), jnp.float32),

        "w3": fan_in_uniform(keys[4], (h1, h2), h1),
        "b3": fan_in_uniform(keys[5], (1, h2), h2),
        "g3": jnp.ones((1, h2), jnp.float32),
        "be3": jnp.zeros((1, h2), jnp.float32),

        "wm": jax.random.uniform(keys[6], (h2, num_outputs), jnp.float32,
                                 -WEIGHTS_FINAL_INIT, WEIGHTS_FINAL_INIT),
        "bm": jax.random.uniform(keys[7], (1, num_outputs), jnp.float32,
                                 -BIAS_FINAL_INIT, BIAS_FINAL_INIT),
    }
    return params


# ------------------------------- pure-JAX reference --------------------------
def actor_reference(x, p):
    def ln_relu(h, g, b):
        mean = jnp.mean(h, axis=-1, keepdims=True)
        var = jnp.mean((h - mean) ** 2, axis=-1, keepdims=True)
        return jnp.maximum((h - mean) / jnp.sqrt(var + LN_EPS) * g + b, 0.0)

    h = ln_relu(x @ p["w1"] + p["b1"], p["g1"], p["be1"])
    h = ln_relu(h @ p["w2"] + p["b2"], p["g2"], p["be2"])
    h = ln_relu(h @ p["w3"] + p["b3"], p["g3"], p["be3"])
    return jnp.tanh(h @ p["wm"] + p["bm"])


if __name__ == "__main__":
    # Small, forward-consistent shapes:
    num_inputs = 32
    hidden_size = [64, 64, 32]
    num_outputs = 4  # action_space.shape[0]

    key = jax.random.PRNGKey(0)
    k_param, k_x1, k_x2 = jax.random.split(key, 3)
    params = init_actor_params(k_param, num_inputs, hidden_size, num_outputs)

    # bf16 MXU operands / bf16 input -> validate against f32 reference loosely.
    TOL = 2e-2

    # Case 1: tiny batch (single grid step).
    x_small = jax.random.normal(k_x1, (8, num_inputs), dtype=jnp.float32)
    mu_small = jax.block_until_ready(actor_forward(x_small, params))
    np.testing.assert_allclose(np.asarray(mu_small),
                               np.asarray(actor_reference(x_small, params)),
                               atol=TOL, rtol=TOL)

    # Case 2: larger, non-multiple batch (exercises 2-step grid + small padding).
    x_big = jax.random.normal(k_x2, (300, num_inputs), dtype=jnp.float32)
    mu_big = jax.block_until_ready(actor_forward(x_big, params))
    np.testing.assert_allclose(np.asarray(mu_big),
                               np.asarray(actor_reference(x_big, params)),
                               atol=TOL, rtol=TOL)

    print("KERNEL_OK")
</pallas_src>

<mosaic_0001>
module attributes {stable_mosaic.version = 11 : i64} {
  func.func @actor_kernel(%arg0: i32, %arg1: memref<8x32xbf16, #tpu.memory_space<vmem>>, %arg2: memref<32x64xbf16, #tpu.memory_space<vmem>>, %arg3: memref<3x64xf32, #tpu.memory_space<vmem>>, %arg4: memref<64x64xbf16, #tpu.memory_space<vmem>>, %arg5: memref<3x64xf32, #tpu.memory_space<vmem>>, %arg6: memref<64x32xbf16, #tpu.memory_space<vmem>>, %arg7: memref<3x32xf32, #tpu.memory_space<vmem>>, %arg8: memref<32x128xbf16, #tpu.memory_space<vmem>>, %arg9: memref<1x128xf32, #tpu.memory_space<vmem>>, %arg10: memref<8x4xf32, #tpu.memory_space<vmem>>) attributes {dimension_semantics = [#tpu.dimension_semantics<parallel>], iteration_bounds = array<i64: 1>, scalar_prefetch = 0 : i64, scratch_operands = 0 : i64, tpu.core_type = #tpu.core_type<tc>, window_params = [{transform_indices = @transform_0, window_bounds = array<i64: 8, 32>}, {pipeline_mode = #tpu.pipeline_mode<synchronous>, transform_indices = @transform_1, window_bounds = array<i64: 32, 64>}, {pipeline_mode = #tpu.pipeline_mode<synchronous>, transform_indices = @transform_2, window_bounds = array<i64: 3, 64>}, {pipeline_mode = #tpu.pipeline_mode<synchronous>, transform_indices = @transform_3, window_bounds = array<i64: 64, 64>}, {pipeline_mode = #tpu.pipeline_mode<synchronous>, transform_indices = @transform_4, window_bounds = array<i64: 3, 64>}, {pipeline_mode = #tpu.pipeline_mode<synchronous>, transform_indices = @transform_5, window_bounds = array<i64: 64, 32>}, {pipeline_mode = #tpu.pipeline_mode<synchronous>, transform_indices = @transform_6, window_bounds = array<i64: 3, 32>}, {pipeline_mode = #tpu.pipeline_mode<synchronous>, transform_indices = @transform_7, window_bounds = array<i64: 32, 128>}, {pipeline_mode = #tpu.pipeline_mode<synchronous>, transform_indices = @transform_8, window_bounds = array<i64: 1, 128>}, {transform_indices = @transform_9, window_bounds = array<i64: 8, 4>}]} {
    %c0 = arith.constant 0 : index
    %c0_0 = arith.constant 0 : index
    %0 = vector.load %arg1[%c0, %c0_0] : memref<8x32xbf16, #tpu.memory_space<vmem>>, vector<8x32xbf16>
    %c0_1 = arith.constant 0 : index
    %c0_2 = arith.constant 0 : index
    %1 = vector.load %arg3[%c0_1, %c0_2] : memref<3x64xf32, #tpu.memory_space<vmem>>, vector<1x64xf32>
    %c0_3 = arith.constant 0 : index
    %c0_4 = arith.constant 0 : index
    %2 = vector.load %arg2[%c0_3, %c0_4] : memref<32x64xbf16, #tpu.memory_space<vmem>>, vector<32x64xbf16>
    %cst = arith.constant dense<0.000000e+00> : vector<8x64xf32>
    %3 = tpu.matmul %0, %2, %cst {dimension_numbers = #tpu.dot_dimension_numbers<[1], [0], [0], [1], [0, 0, 1, 1], [], []>} : vector<8x32xbf16>, vector<32x64xbf16>, vector<8x64xf32> -> vector<8x64xf32>
    %4 = vector.broadcast %1 : vector<1x64xf32> to vector<8x64xf32>
    %5 = arith.addf %3, %4 : vector<8x64xf32>
    %c1 = arith.constant 1 : index
    %c0_5 = arith.constant 0 : index
    %6 = vector.load %arg3[%c1, %c0_5] : memref<3x64xf32, #tpu.memory_space<vmem>>, vector<1x64xf32>
    %c2 = arith.constant 2 : index
    %c0_6 = arith.constant 0 : index
    %7 = vector.load %arg3[%c2, %c0_6] : memref<3x64xf32, #tpu.memory_space<vmem>>, vector<1x64xf32>
    %cst_7 = arith.constant dense<0.000000e+00> : vector<8xf32>
    %8 = vector.multi_reduction <add>, %5, %cst_7 [1] : vector<8x64xf32> to vector<8xf32>
    %9 = vector.shape_cast %8 : vector<8xf32> to vector<8x1xf32>
    %cst_8 = arith.constant 1.562500e-02 : f32
    %10 = vector.broadcast %cst_8 : f32 to vector<8x1xf32>
    %11 = arith.mulf %9, %10 : vector<8x1xf32>
    %12 = arith.mulf %5, %5 : vector<8x64xf32>
    %cst_9 = arith.constant dense<0.000000e+00> : vector<8xf32>
    %13 = vector.multi_reduction <add>, %12, %cst_9 [1] : vector<8x64xf32> to vector<8xf32>
    %14 = vector.shape_cast %13 : vector<8xf32> to vector<8x1xf32>
    %cst_10 = arith.constant 1.562500e-02 : f32
    %15 = vector.broadcast %cst_10 : f32 to vector<8x1xf32>
    %16 = arith.mulf %14, %15 : vector<8x1xf32>
    %17 = arith.mulf %11, %11 : vector<8x1xf32>
    %18 = arith.subf %16, %17 : vector<8x1xf32>
    %cst_11 = arith.constant 0.000000e+00 : f32
    %19 = vector.broadcast %cst_11 : f32 to vector<8x1xf32>
    %20 = arith.maximumf %18, %19 : vector<8x1xf32>
    %21 = vector.broadcast %11 : vector<8x1xf32> to vector<8x64xf32>
    %22 = arith.subf %5, %21 : vector<8x64xf32>
    %cst_12 = arith.constant 9.99999974E-6 : f32
    %23 = vector.broadcast %cst_12 : f32 to vector<8x1xf32>
    %24 = arith.addf %20, %23 : vector<8x1xf32>
    %25 = math.rsqrt %24 : vector<8x1xf32>
    %26 = vector.broadcast %25 : vector<8x1xf32> to vector<8x64xf32>
    %27 = arith.mulf %22, %26 : vector<8x64xf32>
    %28 = vector.broadcast %6 : vector<1x64xf32> to vector<8x64xf32>
    %29 = arith.mulf %27, %28 : vector<8x64xf32>
    %30 = vector.broadcast %7 : vector<1x64xf32> to vector<8x64xf32>
    %31 = arith.addf %29, %30 : vector<8x64xf32>
    %cst_13 = arith.constant 0.000000e+00 : f32
    %32 = vector.broadcast %cst_13 : f32 to vector<8x64xf32>
    %33 = arith.maximumf %31, %32 : vector<8x64xf32>
    %34 = arith.truncf %33 : vector<8x64xf32> to vector<8x64xbf16>
    %c0_14 = arith.constant 0 : index
    %c0_15 = arith.constant 0 : index
    %35 = vector.load %arg5[%c0_14, %c0_15] : memref<3x64xf32, #tpu.memory_space<vmem>>, vector<1x64xf32>
    %c0_16 = arith.constant 0 : index
    %c0_17 = arith.constant 0 : index
    %36 = vector.load %arg4[%c0_16, %c0_17] : memref<64x64xbf16, #tpu.memory_space<vmem>>, vector<64x64xbf16>
    %cst_18 = arith.constant dense<0.000000e+00> : vector<8x64xf32>
    %37 = tpu.matmul %34, %36, %cst_18 {dimension_numbers = #tpu.dot_dimension_numbers<[1], [0], [0], [1], [0, 0, 1, 1], [], []>} : vector<8x64xbf16>, vector<64x64xbf16>, vector<8x64xf32> -> vector<8x64xf32>
    %38 = vector.broadcast %35 : vector<1x64xf32> to vector<8x64xf32>
    %39 = arith.addf %37, %38 : vector<8x64xf32>
    %c1_19 = arith.constant 1 : index
    %c0_20 = arith.constant 0 : index
    %40 = vector.load %arg5[%c1_19, %c0_20] : memref<3x64xf32, #tpu.memory_space<vmem>>, vector<1x64xf32>
    %c2_21 = arith.constant 2 : index
    %c0_22 = arith.constant 0 : index
    %41 = vector.load %arg5[%c2_21, %c0_22] : memref<3x64xf32, #tpu.memory_space<vmem>>, vector<1x64xf32>
    %cst_23 = arith.constant dense<0.000000e+00> : vector<8xf32>
    %42 = vector.multi_reduction <add>, %39, %cst_23 [1] : vector<8x64xf32> to vector<8xf32>
    %43 = vector.shape_cast %42 : vector<8xf32> to vector<8x1xf32>
    %cst_24 = arith.constant 1.562500e-02 : f32
    %44 = vector.broadcast %cst_24 : f32 to vector<8x1xf32>
    %45 = arith.mulf %43, %44 : vector<8x1xf32>
    %46 = arith.mulf %39, %39 : vector<8x64xf32>
    %cst_25 = arith.constant dense<0.000000e+00> : vector<8xf32>
    %47 = vector.multi_reduction <add>, %46, %cst_25 [1] : vector<8x64xf32> to vector<8xf32>
    %48 = vector.shape_cast %47 : vector<8xf32> to vector<8x1xf32>
    %cst_26 = arith.constant 1.562500e-02 : f32
    %49 = vector.broadcast %cst_26 : f32 to vector<8x1xf32>
    %50 = arith.mulf %48, %49 : vector<8x1xf32>
    %51 = arith.mulf %45, %45 : vector<8x1xf32>
    %52 = arith.subf %50, %51 : vector<8x1xf32>
    %cst_27 = arith.constant 0.000000e+00 : f32
    %53 = vector.broadcast %cst_27 : f32 to vector<8x1xf32>
    %54 = arith.maximumf %52, %53 : vector<8x1xf32>
    %55 = vector.broadcast %45 : vector<8x1xf32> to vector<8x64xf32>
    %56 = arith.subf %39, %55 : vector<8x64xf32>
    %cst_28 = arith.constant 9.99999974E-6 : f32
    %57 = vector.broadcast %cst_28 : f32 to vector<8x1xf32>
    %58 = arith.addf %54, %57 : vector<8x1xf32>
    %59 = math.rsqrt %58 : vector<8x1xf32>
    %60 = vector.broadcast %59 : vector<8x1xf32> to vector<8x64xf32>
    %61 = arith.mulf %56, %60 : vector<8x64xf32>
    %62 = vector.broadcast %40 : vector<1x64xf32> to vector<8x64xf32>
    %63 = arith.mulf %61, %62 : vector<8x64xf32>
    %64 = vector.broadcast %41 : vector<1x64xf32> to vector<8x64xf32>
    %65 = arith.addf %63, %64 : vector<8x64xf32>
    %cst_29 = arith.constant 0.000000e+00 : f32
    %66 = vector.broadcast %cst_29 : f32 to vector<8x64xf32>
    %67 = arith.maximumf %65, %66 : vector<8x64xf32>
    %68 = arith.truncf %67 : vector<8x64xf32> to vector<8x64xbf16>
    %c0_30 = arith.constant 0 : index
    %c0_31 = arith.constant 0 : index
    %69 = vector.load %arg7[%c0_30, %c0_31] : memref<3x32xf32, #tpu.memory_space<vmem>>, vector<1x32xf32>
    %c0_32 = arith.constant 0 : index
    %c0_33 = arith.constant 0 : index
    %70 = vector.load %arg6[%c0_32, %c0_33] : memref<64x32xbf16, #tpu.memory_space<vmem>>, vector<64x32xbf16>
    %cst_34 = arith.constant dense<0.000000e+00> : vector<8x32xf32>
    %71 = tpu.matmul %68, %70, %cst_34 {dimension_numbers = #tpu.dot_dimension_numbers<[1], [0], [0], [1], [0, 0, 1, 1], [], []>} : vector<8x64xbf16>, vector<64x32xbf16>, vector<8x32xf32> -> vector<8x32xf32>
    %72 = vector.broadcast %69 : vector<1x32xf32> to vector<8x32xf32>
    %73 = arith.addf %71, %72 : vector<8x32xf32>
    %c1_35 = arith.constant 1 : index
    %c0_36 = arith.constant 0 : index
    %74 = vector.load %arg7[%c1_35, %c0_36] : memref<3x32xf32, #tpu.memory_space<vmem>>, vector<1x32xf32>
    %c2_37 = arith.constant 2 : index
    %c0_38 = arith.constant 0 : index
    %75 = vector.load %arg7[%c2_37, %c0_38] : memref<3x32xf32, #tpu.memory_space<vmem>>, vector<1x32xf32>
    %cst_39 = arith.constant dense<0.000000e+00> : vector<8xf32>
    %76 = vector.multi_reduction <add>, %73, %cst_39 [1] : vector<8x32xf32> to vector<8xf32>
    %77 = vector.shape_cast %76 : vector<8xf32> to vector<8x1xf32>
    %cst_40 = arith.constant 3.125000e-02 : f32
    %78 = vector.broadcast %cst_40 : f32 to vector<8x1xf32>
    %79 = arith.mulf %77, %78 : vector<8x1xf32>
    %80 = arith.mulf %73, %73 : vector<8x32xf32>
    %cst_41 = arith.constant dense<0.000000e+00> : vector<8xf32>
    %81 = vector.multi_reduction <add>, %80, %cst_41 [1] : vector<8x32xf32> to vector<8xf32>
    %82 = vector.shape_cast %81 : vector<8xf32> to vector<8x1xf32>
    %cst_42 = arith.constant 3.125000e-02 : f32
    %83 = vector.broadcast %cst_42 : f32 to vector<8x1xf32>
    %84 = arith.mulf %82, %83 : vector<8x1xf32>
    %85 = arith.mulf %79, %79 : vector<8x1xf32>
    %86 = arith.subf %84, %85 : vector<8x1xf32>
    %cst_43 = arith.constant 0.000000e+00 : f32
    %87 = vector.broadcast %cst_43 : f32 to vector<8x1xf32>
    %88 = arith.maximumf %86, %87 : vector<8x1xf32>
    %89 = vector.broadcast %79 : vector<8x1xf32> to vector<8x32xf32>
    %90 = arith.subf %73, %89 : vector<8x32xf32>
    %cst_44 = arith.constant 9.99999974E-6 : f32
    %91 = vector.broadcast %cst_44 : f32 to vector<8x1xf32>
    %92 = arith.addf %88, %91 : vector<8x1xf32>
    %93 = math.rsqrt %92 : vector<8x1xf32>
    %94 = vector.broadcast %93 : vector<8x1xf32> to vector<8x32xf32>
    %95 = arith.mulf %90, %94 : vector<8x32xf32>
    %96 = vector.broadcast %74 : vector<1x32xf32> to vector<8x32xf32>
    %97 = arith.mulf %95, %96 : vector<8x32xf32>
    %98 = vector.broadcast %75 : vector<1x32xf32> to vector<8x32xf32>
    %99 = arith.addf %97, %98 : vector<8x32xf32>
    %cst_45 = arith.constant 0.000000e+00 : f32
    %100 = vector.broadcast %cst_45 : f32 to vector<8x32xf32>
    %101 = arith.maximumf %99, %100 : vector<8x32xf32>
    %102 = arith.truncf %101 : vector<8x32xf32> to vector<8x32xbf16>
    %c0_46 = arith.constant 0 : index
    %c0_47 = arith.constant 0 : index
    %103 = vector.load %arg9[%c0_46, %c0_47] : memref<1x128xf32, #tpu.memory_space<vmem>>, vector<1x128xf32>
    %c0_48 = arith.constant 0 : index
    %c0_49 = arith.constant 0 : index
    %104 = vector.load %arg8[%c0_48, %c0_49] : memref<32x128xbf16, #tpu.memory_space<vmem>>, vector<32x128xbf16>
    %cst_50 = arith.constant dense<0.000000e+00> : vector<8x128xf32>
    %105 = tpu.matmul %102, %104, %cst_50 {dimension_numbers = #tpu.dot_dimension_numbers<[1], [0], [0], [1], [0, 0, 1, 1], [], []>} : vector<8x32xbf16>, vector<32x128xbf16>, vector<8x128xf32> -> vector<8x128xf32>
    %106 = vector.broadcast %103 : vector<1x128xf32> to vector<8x128xf32>
    %107 = arith.addf %105, %106 : vector<8x128xf32>
    %108 = vector.extract_strided_slice %107 {offsets = [0, 0], sizes = [8, 4], strides = [1, 1]} : vector<8x128xf32> to vector<8x4xf32>
    %109 = math.tanh %108 : vector<8x4xf32>
    %c0_51 = arith.constant 0 : index
    %c0_52 = arith.constant 0 : index
    %110 = vector.load %arg10[%c0_51, %c0_52] : memref<8x4xf32, #tpu.memory_space<vmem>>, vector<8x4xf32>
    tpu.vector_store %arg10[%c0_51, %c0_52], %109 {strides = array<i32>} : memref<8x4xf32, #tpu.memory_space<vmem>>, vector<8x4xf32>,
    return
  }
  func.func @transform_0(%arg0: i32) -> (i32, i32) {
    %c0_i32 = arith.constant 0 : i32
    %c0_i32_0 = arith.constant 0 : i32
    return %arg0, %c0_i32 : i32, i32
  }
  func.func @transform_1(%arg0: i32) -> (i32, i32) {
    %c0_i32 = arith.constant 0 : i32
    %c0_i32_0 = arith.constant 0 : i32
    %c0_i32_1 = arith.constant 0 : i32
    return %c0_i32, %c0_i32_0 : i32, i32
  }
  func.func @transform_2(%arg0: i32) -> (i32, i32) {
    %c0_i32 = arith.constant 0 : i32
    %c0_i32_0 = arith.constant 0 : i32
    %c0_i32_1 = arith.constant 0 : i32
    return %c0_i32, %c0_i32_0 : i32, i32
  }
  func.func @transform_3(%arg0: i32) -> (i32, i32) {
    %c0_i32 = arith.constant 0 : i32
    %c0_i32_0 = arith.constant 0 : i32
    %c0_i32_1 = arith.constant 0 : i32
    return %c0_i32, %c0_i32_0 : i32, i32
  }
  func.func @transform_4(%arg0: i32) -> (i32, i32) {
    %c0_i32 = arith.constant 0 : i32
    %c0_i32_0 = arith.constant 0 : i32
    %c0_i32_1 = arith.constant 0 : i32
    return %c0_i32, %c0_i32_0 : i32, i32
  }
  func.func @transform_5(%arg0: i32) -> (i32, i32) {
    %c0_i32 = arith.constant 0 : i32
    %c0_i32_0 = arith.constant 0 : i32
    %c0_i32_1 = arith.constant 0 : i32
    return %c0_i32, %c0_i32_0 : i32, i32
  }
  func.func @transform_6(%arg0: i32) -> (i32, i32) {
    %c0_i32 = arith.constant 0 : i32
    %c0_i32_0 = arith.constant 0 : i32
    %c0_i32_1 = arith.constant 0 : i32
    return %c0_i32, %c0_i32_0 : i32, i32
  }
  func.func @transform_7(%arg0: i32) -> (i32, i32) {
    %c0_i32 = arith.constant 0 : i32
    %c0_i32_0 = arith.constant 0 : i32
    %c0_i32_1 = arith.constant 0 : i32
    return %c0_i32, %c0_i32_0 : i32, i32
  }
  func.func @transform_8(%arg0: i32) -> (i32, i32) {
    %c0_i32 = arith.constant 0 : i32
    %c0_i32_0 = arith.constant 0 : i32
    %c0_i32_1 = arith.constant 0 : i32
    return %c0_i32, %c0_i32_0 : i32, i32
  }
  func.func @transform_9(%arg0: i32) -> (i32, i32) {
    %c0_i32 = arith.constant 0 : i32
    %c0_i32_0 = arith.constant 0 : i32
    return %arg0, %c0_i32 : i32, i32
  }
}

</mosaic_0001>

<bundles_post_ra>
// kernel: tpu_custom_call.1
= control target key start
LH: loop header
LB: loop body
LE: loop exit
PB: predicated region body
PF: predicated region fallthrough
CT: control target
= control target key end

     0   :  { %14 = vsyncpa [#allocation3], 0  ;;  %s867_s0 = inlined_call_operand.hbm [shape: bf16[8,32], index: 0, kind: input, shape index: {}]   ;;  %s868_s1 = inlined_call_operand.vmem [shape: bf16[32,64], index: 1, kind: input, shape index: {}]   ;;  %s869_s2 = inlined_call_operand.hbm [shape: f32[3,64], index: 2, kind: input, shape index: {}]   ;;  %s870_s3 = inlined_call_operand.vmem [shape: bf16[64,64], index: 3, kind: input, shape index: {}]   ;;  %s871_s4 = inlined_call_operand.hbm [shape: f32[3,64], index: 4, kind: input, shape index: {}]   ;;  %s872_s5 = inlined_call_operand.vmem [shape: bf16[64,32], index: 5, kind: input, shape index: {}]   ;;  %s873_s6 = inlined_call_operand.vmem [shape: f32[3,32], index: 6, kind: input, shape index: {}]   ;;  %s874_s7 = inlined_call_operand.hbm [shape: bf16[32,128], index: 7, kind: input, shape index: {}]   ;;  %s875_s8 = inlined_call_operand.vmem [shape: f32[1,128], index: 8, kind: input, shape index: {}]   ;;  %s876_s9 = inlined_call_operand.vmem [shape: f32[8,4], index: 9, kind: output, shape index: {}]  }
   0x1   :  { %15 = vsyncpa [#allocation5], 0 }
   0x2   :  { %16 = vsyncpa [#allocation8], 0  ;;  %s679_s30 = smov [#allocation4]   ;;  %s680_s11 = smov [#allocation2]  }
   0x3   :  { %s35_s10 = sshll.u32 %s679_s30, 4  ;;  %s23_s12 = sshll.u32 %s680_s11, 4  ;;  %s36_s10 = int_to_ptr.vmem [resolvable:$true] %s35_s10  ;;  %s24_s12 = int_to_ptr.vmem [resolvable:$true] %s23_s12 }
   0x4   :  { %s585_s15 = scalar_lea.hbm %s869_s2, 64 }
   0x5   :  { %p586_p0 = scmp.ne.s32.totalorder %s869_s2, %s585_s15  ;;  %p589_p1 = scmp.lt.u32.totalorder %s585_s15, %s869_s2 }
   0x7   :  { %p591_p2 = pnand %p589_p1, %p586_p0 }
   0x9   :  { %594 = shalt.err (!%p591_p2)
}
   0xa   :  { %s595_s20 = scalar_lea.vmem %s36_s10, 64  ;;  %p600_p4 = scmp.lt.s32.totalorder %s36_s10, %s36_s10 }
   0xb   :  { %p596_p3 = scmp.ne.s32.totalorder %s36_s10, %s595_s20  ;;  %p601_p5 = scmp.lt.s32.totalorder %s595_s20, %s595_s20 }
   0xd   :  { %p602_p6 = por %p601_p5, %p600_p4 }
   0xf   :  { %p603_p7 = pnand %p602_p6, %p596_p3 }
  0x11   :  { %606 = shalt.err (!%p603_p7)
}
  0x12   :  { %38 = dma.hbm_to_vmem [thread:$0]  %s869_s2, 64, %s36_s10, [#allocation5]  }
  0x13   :  { %s607_s25 = scalar_lea.hbm %s867_s0, 64 }
  0x14   :  { %p608_p8 = scmp.ne.s32.totalorder %s867_s0, %s607_s25  ;;  %p611_p9 = scmp.lt.u32.totalorder %s607_s25, %s867_s0 }
  0x16   :  { %p613_p10 = pnand %p611_p9, %p608_p8 }
  0x18   :  { %616 = shalt.err (!%p613_p10)
}
  0x19   :  { %s617_s30 = scalar_lea.vmem %s24_s12, 64  ;;  %p622_p12 = scmp.lt.s32.totalorder %s24_s12, %s24_s12 }
  0x1a   :  { %p618_p11 = scmp.ne.s32.totalorder %s24_s12, %s617_s30  ;;  %p623_p13 = scmp.lt.s32.totalorder %s617_s30, %s617_s30 }
  0x1c   :  { %p624_p0 = por %p623_p13, %p622_p12 }
  0x1e   :  { %p625_p1 = pnand %p624_p0, %p618_p11 }
  0x20   :  { %628 = shalt.err (!%p625_p1)
}
  0x21   :  { %26 = dma.hbm_to_vmem [thread:$0]  %s867_s0, 64, %s24_s12, [#allocation3]  }
  0x22   :  { %s681_s11 = smov [#allocation6]   ;;  %s682_s14 = smov [#allocation7]  }
  0x23   :  { %s47_s13 = sshll.u32 %s681_s11, 4  ;;  %s60_s15 = sshll.u32 %s682_s14, 4  ;;  %s48_s13 = int_to_ptr.vmem [resolvable:$true] %s47_s13  ;;  %s761_s15 = int_to_ptr.vmem [resolvable:$true] %s60_s15 }
  0x24   :  { %s629_s18 = scalar_lea.hbm %s871_s4, 64 }
  0x25   :  { %p630_p2 = scmp.ne.s32.totalorder %s871_s4, %s629_s18  ;;  %p633_p3 = scmp.lt.u32.totalorder %s629_s18, %s871_s4 }
  0x27   :  { %p635_p4 = pnand %p633_p3, %p630_p2 }
  0x29   :  { %638 = shalt.err (!%p635_p4)
}
  0x2a   :  { %s639_s0 = scalar_lea.vmem %s48_s13, 64  ;;  %p644_p6 = scmp.lt.s32.totalorder %s48_s13, %s48_s13 }
  0x2b   :  { %p640_p5 = scmp.ne.s32.totalorder %s48_s13, %s639_s0  ;;  %p645_p7 = scmp.lt.s32.totalorder %s639_s0, %s639_s0 }
  0x2d   :  { %p646_p8 = por %p645_p7, %p644_p6 }
  0x2f   :  { %p647_p9 = pnand %p646_p8, %p640_p5 }
  0x31   :  { %650 = shalt.err (!%p647_p9)
}
  0x32   :  { %50 = dma.hbm_to_vmem [thread:$0]  %s871_s4, 64, %s48_s13, [#allocation5]  }
  0x33   :  { %s651_s26 = scalar_lea.hbm %s874_s7, 256 }
  0x34   :  { %p652_p10 = scmp.ne.s32.totalorder %s874_s7, %s651_s26  ;;  %p655_p11 = scmp.lt.u32.totalorder %s651_s26, %s874_s7 }
  0x36   :  { %p657_p12 = pnand %p655_p11, %p652_p10 }
  0x38   :  { %660 = shalt.err (!%p657_p12)
}
  0x39   :  { %s661_s2 = scalar_lea.vmem %s761_s15, 256  ;;  %p666_p0 = scmp.lt.s32.totalorder %s761_s15, %s761_s15 }
  0x3a   :  { %p662_p13 = scmp.ne.s32.totalorder %s761_s15, %s661_s2  ;;  %p667_p1 = scmp.lt.s32.totalorder %s661_s2, %s661_s2 }
  0x3c   :  { %p668_p2 = por %p667_p1, %p666_p0 }
  0x3e   :  { %p669_p3 = pnand %p668_p2, %p662_p13 }
  0x40   :  { %672 = shalt.err (!%p669_p3)
}
  0x41   :  { %s683_s4 = smov 64   ;;  %s684_s10 = smov 4  }
  0x42   :  { %66 = dma.hbm_to_vmem [thread:$0]  %s874_s7, 256, %s761_s15, [#allocation8], %s683_s4, %s683_s4, %s684_s10  }
  0x43   :  { %673 = dma.done.wait [#allocation3], 64  }
  0x44   :  { %674 = vsyncadd [#allocation3], 4294967232 }
  0x45   :  { %675 = dma.done.wait [#allocation5], 128  }
  0x46   :  { %676 = vsyncadd [#allocation5], 4294967168 }
  0x47   :  { %677 = dma.done.wait [#allocation8], 256  }
  0x48   :  { %678 = vsyncadd [#allocation8], 4294967040  ;;  %v685_v0 = vmov 0.0   ;;  %vm686_vm0 = vmmov 0   ;;  %v565_v1 = vld [vmem:[%s868_s1] sm:$0xff]   ;;  %v566_v2 = vld [vmem:[%s868_s1 + $0x8] sm:$0xff]  }
  0x49   :  { %517 = vmatprep.subr.bf16.mxu0 %v685_v0  ;;  %521 = vmatprep.mubr.msk.bf16.mxu0 %vm686_vm0, %v685_v0  ;;  %vm104_vm1 = vcmask 261120   ;;  %v82_v3 = vld [vmem:[#allocation2] sm:$0xf]  ;;  %v475_v4 = vld [vmem:[#allocation4] ss:$0 sm:$0xff]  ;;  %vm150_vm2 = vcmask 523264  }
  0x4a   :  { %525 = vmatprep.subr.bf16.mxu1 %v685_v0  ;;  %533 = vmatprep.mubr.msk.bf16.mxu1 %vm686_vm0, %v685_v0  ;;  %v567_v13 = vld [vmem:[%s870_s3] sm:$0xff]   ;;  %v568_v14 = vld [vmem:[%s870_s3 + $0x8] sm:$0xff]   ;;  %v569_v15 = vld [vmem:[%s870_s3 + $0x10] sm:$0xff]   ;;  %vm466_vm3 = vcmask 31744  }
  0x4b   :  { %518 = vmatpush3.bf16.msra.mxu0 %v565_v1  ;;  %526 = vmatpush3.bf16.msra.mxu1 %v567_v13  ;;  %v570_v16 = vld [vmem:[%s870_s3 + $0x18] sm:$0xff]   ;;  %v479_v27 = vld [vmem:[#allocation4 + $0x1] ss:$0 sm:$0xff]  ;;  %v480_v29 = vld [vmem:[#allocation4 + $0x2] ss:$0 sm:$0xff] }
  0x4c   :  { %519 = vmatprep.subr.bf16.mxu0 %v685_v0  ;;  %527 = vmatprep.subr.bf16.mxu1 %v685_v0  ;;  %v481_v34 = vld [vmem:[#allocation6] ss:$0 sm:$0xff]  ;;  %v571_v43 = vld [vmem:[%s872_s5] sm:$0xff]   ;;  %v573_v45 = vld [vmem:[%s872_s5 + $0x10] sm:$0xff]  }
  0x4d   :  { %v572_v44 = vld [vmem:[%s872_s5 + $0x8] sm:$0xff]   ;;  %v574_v46 = vld [vmem:[%s872_s5 + $0x18] sm:$0xff]   ;;  %v489_v1 = vld [vmem:[%s873_s6] ss:$0 sm:$0xff] }
  0x4e   :  { %v487_v57 = vld [vmem:[#allocation6 + $0x1] ss:$0 sm:$0xff]  ;;  %v488_v59 = vld [vmem:[#allocation6 + $0x2] ss:$0 sm:$0xff] }
  0x4f   :  { %520 = vmatpush3.bf16.msra.mxu0 %v566_v2  ;;  %528 = vmatpush3.bf16.msra.mxu1 %v568_v14 }
  0x50   :  { %537 = vmatprep.subr.bf16.mxu0 %v685_v0  ;;  %529 = vmatprep.subr.bf16.mxu1 %v685_v0 }
  0x52   :  { %522 = vmatmul.mubr.msk.bf16.vlgmr.msra.gmra.mrb[0].mxu0 %vm104_vm1, %v82_v3 }
  0x53   :  { %545 = vmatprep.mubr.msk.bf16.mxu0 %vm686_vm0, %v685_v0  ;;  %530 = vmatpush3.bf16.msra.mxu1 %v569_v15 }
  0x54   :  { %531 = vmatprep.subr.bf16.mxu1 %v685_v0  ;;  %538 = vmatpush3.bf16.msra.mxu0 %v571_v43 }
  0x55   :  { %539 = vmatprep.subr.bf16.mxu0 %v685_v0 }
  0x57   :  { %532 = vmatpush3.bf16.msra.mxu1 %v570_v16 }
  0x58   :  { %549 = vmatprep.subr.bf16.mxu1 %v685_v0  ;;  %540 = vmatpush3.bf16.msra.mxu0 %v572_v44 }
  0x59   :  { %541 = vmatprep.subr.bf16.mxu0 %v685_v0 }
  0x5c   :  { %542 = vmatpush3.bf16.msra.mxu0 %v573_v45 }
  0x5d   :  { %543 = vmatprep.subr.bf16.mxu0 %v685_v0 }
  0x60   :  { %544 = vmatpush3.bf16.msra.mxu0 %v574_v46 }
 0x125   :  { %v142_v5 = vpop.f32.mrb[0].mxu0 }
 0x126   :  { %v143_v6 = vadd.f32 %v475_v4, %v142_v5  ;;  %v523_v7 = vpop.f32.mrb[1].mxu0 }
 0x127   :  { %v145_v8 = vpop.f32.mrb[2].mxu0 }
 0x128   :  { %v524_v9 = vpop.f32.mrb[3].mxu0  ;;  %v151_v10 = vsel %vm150_vm2, %v143_v6, 0.0  ;;  %v155_v11 = vmul.f32 %v143_v6, %v143_v6 }
 0x129   :  { %152 = vadd.xlane.f32.xlu0 %v151_v10  ;;  %v575_v10 = vld [vmem:[#allocation7] sm:$0xff]  }
 0x12a   :  { %v156_v12 = vsel %vm150_vm2, %v155_v11, 0.0  ;;  %v576_v11 = vld [vmem:[#allocation7 + $0x8] sm:$0xff]  }
 0x12d   :  { %157 = vadd.xlane.f32.xlu0 %v156_v12 }
 0x1b6   :  { %v153_v17 = vpop.xlane.xlu0 %152 }
 0x1b7   :  { %v154_v18 = vmul.f32 0.015625, %v153_v17 }
 0x1b9   :  { %v160_v20 = vmul.f32 %v154_v18, %v154_v18  ;;  %v163_v25 = vsub.f32 %v143_v6, %v154_v18 }
 0x1ba   :  { %v158_v19 = vpop.xlane.xlu0 %157 }
 0x1bb   :  { %v159_v21 = vmul.f32 0.015625, %v158_v19 }
 0x1bd   :  { %v161_v22 = vsub.f32 %v159_v21, %v160_v20 }
 0x1bf   :  { %v162_v23 = vmax.f32 %v161_v22, 0.0  ;;  %v495_v22 = vld [vmem:[%s873_s6 + $0x1] ss:$0 sm:$0xff] }
 0x1c1   :  { %v164_v24 = vadd.f32 1e-05, %v162_v23 }
 0x1c3   :  { %577 = vrsqrt.f32 %v164_v24 }
 0x1cd   :  { %v578_v26 = vpop.eup %577 }
 0x1ce   :  { %v166_v28 = vmul.f32 %v578_v26, %v163_v25 }
 0x1d0   :  { %v171_v30 = vmul.f32 %v479_v27, %v166_v28  ;;  %v497_v28 = vld [vmem:[%s875_s8] ss:$0 sm:$0xff] }
 0x1d2   :  { %v176_v31 = vadd.f32 %v480_v29, %v171_v30 }
 0x1d4   :  { %v177_v32 = vmax.f32 %v176_v31, 0.0 }
 0x1d6   :  { %v178_v33 = vpack.c.bf16 %v177_v32, %v177_v32 }
 0x1d8   :  { %534 = vmatmul.mubr.msk.bf16.vlgmr.msra.gmra.mrb[0].mxu1 %vm150_vm2, %v178_v33 }
 0x1d9   :  { %553 = vmatprep.mubr.msk.bf16.mxu1 %vm686_vm0, %v685_v0  ;;  %550 = vmatpush3.bf16.msra.mxu1 %v575_v10 }
 0x1da   :  { %551 = vmatprep.subr.bf16.mxu1 %v685_v0  ;;  %v496_v0 = vld [vmem:[%s873_s6 + $0x2] ss:$0 sm:$0xff] }
 0x1dd   :  { %552 = vmatpush3.bf16.msra.mxu1 %v576_v11 }
 0x2ab   :  { %v253_v35 = vpop.f32.mrb[0].mxu1 }
 0x2ac   :  { %v254_v36 = vadd.f32 %v481_v34, %v253_v35  ;;  %v535_v37 = vpop.f32.mrb[1].mxu1 }
 0x2ad   :  { %v256_v38 = vpop.f32.mrb[2].mxu1 }
 0x2ae   :  { %v536_v39 = vpop.f32.mrb[3].mxu1  ;;  %v261_v40 = vsel %vm150_vm2, %v254_v36, 0.0  ;;  %v265_v41 = vmul.f32 %v254_v36, %v254_v36 }
 0x2af   :  { %262 = vadd.xlane.f32.xlu1 %v261_v40 }
 0x2b0   :  { %v266_v42 = vsel %vm150_vm2, %v265_v41, 0.0 }
 0x2b3   :  { %267 = vadd.xlane.f32.xlu1 %v266_v42 }
 0x33c   :  { %v263_v47 = vpop.xlane.xlu1 %262 }
 0x33d   :  { %v264_v48 = vmul.f32 0.015625, %v263_v47 }
 0x33f   :  { %v270_v50 = vmul.f32 %v264_v48, %v264_v48  ;;  %v273_v55 = vsub.f32 %v254_v36, %v264_v48 }
 0x340   :  { %v268_v49 = vpop.xlane.xlu1 %267 }
 0x341   :  { %v269_v51 = vmul.f32 0.015625, %v268_v49 }
 0x343   :  { %v271_v52 = vsub.f32 %v269_v51, %v270_v50 }
 0x345   :  { %v272_v53 = vmax.f32 %v271_v52, 0.0 }
 0x347   :  { %v274_v54 = vadd.f32 1e-05, %v272_v53 }
 0x349   :  { %579 = vrsqrt.f32 %v274_v54 }
 0x353   :  { %v580_v56 = vpop.eup %579 }
 0x354   :  { %v276_v58 = vmul.f32 %v580_v56, %v273_v55 }
 0x356   :  { %v281_v60 = vmul.f32 %v487_v57, %v276_v58 }
 0x358   :  { %v286_v61 = vadd.f32 %v488_v59, %v281_v60 }
 0x35a   :  { %v287_v62 = vmax.f32 %v286_v61, 0.0 }
 0x35c   :  { %v288_v63 = vpack.c.bf16 %v287_v62, %v287_v62 }
 0x35e   :  { %546 = vmatmul.mubr.msk.bf16.vlgmr.msra.gmra.mrb[4].mxu0 %vm150_vm2, %v288_v63 }
 0x431   :  { %v363_v2 = vpop.f32.mrb[4].mxu0 }
 0x432   :  { %v364_v3 = vadd.f32 %v489_v1, %v363_v2  ;;  %v547_v4 = vpop.f32.mrb[5].mxu0 }
 0x433   :  { %v366_v5 = vpop.f32.mrb[6].mxu0 }
 0x434   :  { %v548_v6 = vpop.f32.mrb[7].mxu0  ;;  %v371_v7 = vsel %vm104_vm1, %v364_v3, 0.0  ;;  %v375_v8 = vmul.f32 %v364_v3, %v364_v3 }
 0x435   :  { %372 = vadd.xlane.f32.xlu0 %v371_v7 }
 0x436   :  { %v376_v9 = vsel %vm104_vm1, %v375_v8, 0.0 }
 0x437   :  { %377 = vadd.xlane.f32.xlu1 %v376_v9 }
 0x4c2   :  { %v373_v12 = vpop.xlane.xlu0 %372 }
 0x4c3   :  { %v374_v13 = vmul.f32 0.03125, %v373_v12 }
 0x4c4   :  { %v378_v14 = vpop.xlane.xlu1 %377 }
 0x4c5   :  { %v380_v15 = vmul.f32 %v374_v13, %v374_v13  ;;  %v379_v16 = vmul.f32 0.03125, %v378_v14  ;;  %v383_v20 = vsub.f32 %v364_v3, %v374_v13 }
 0x4c7   :  { %v381_v17 = vsub.f32 %v379_v16, %v380_v15 }
 0x4c9   :  { %v382_v18 = vmax.f32 %v381_v17, 0.0 }
 0x4cb   :  { %v384_v19 = vadd.f32 1e-05, %v382_v18 }
 0x4cd   :  { %581 = vrsqrt.f32 %v384_v19 }
 0x4d7   :  { %v582_v21 = vpop.eup %581 }
 0x4d8   :  { %v386_v23 = vmul.f32 %v582_v21, %v383_v20 }
 0x4da   :  { %v391_v24 = vmul.f32 %v495_v22, %v386_v23 }
 0x4dc   :  { %v396_v25 = vadd.f32 %v496_v0, %v391_v24 }
 0x4de   :  { %v397_v26 = vmax.f32 %v396_v25, 0.0 }
 0x4e0   :  { %v398_v27 = vpack.c.bf16 %v397_v26, %v397_v26 }
 0x4e2   :  { %554 = vmatmul.mubr.msk.bf16.vlgmr.msra.gmra.mrb[4].mxu1 %vm104_vm1, %v398_v27 }
 0x5b5   :  { %v459_v29 = vpop.f32.mrb[4].mxu1 }
 0x5b6   :  { %v460_v30 = vadd.f32 %v497_v28, %v459_v29  ;;  %v555_v31 = vpop.f32.mrb[5].mxu1 }
 0x5b7   :  { %v462_v32 = vpop.f32.mrb[6].mxu1 }
 0x5b8   :  { %583 = vtanh.f32 %v460_v30  ;;  %v556_v33 = vpop.f32.mrb[7].mxu1 }
 0x5c2   :  { %v584_v34 = vpop.eup %583 }
 0x5c3   :  { %467 = vst.msk [vmem:[%s876_s9] sm:$0xff] %vm466_vm3, %v584_v34 }
 0x5c4   :  { %472 = vsyncpa [#allocation3], 1 }
 0x5c5   :  { %473 = vsyncpa [#allocation5], 1 }
 0x5c6   :  { %474 = vsyncpa [#allocation8], 1 }

</bundles_post_ra>
